<compile_context>
chip_gen: v6e
topology: v6e:2x2x1
jax: 0.10.0
libtpu: 0.0.40
codegen_flags: <defaults>
</compile_context>

<pallas_src>
import jax
import jax.numpy as jnp
from jax.experimental import pallas as pl
from jax.experimental.pallas import tpu as pltpu


def _copy_kernel(x_ref, o_ref):
    # Pure bandwidth-bound copy: one full-tile assignment, nothing else.
    o_ref[...] = x_ref[...]


def _pick_row_block(total_rows: int, row_bytes: int, budget_bytes: int = 2 << 20) -> int:
    """Row-block size that (a) satisfies the (8, 128) sublane rule (multiple
    of 8 or the full extent), (b) divides total_rows, and (c) keeps one tile
    within budget_bytes."""
    if total_rows % 8 != 0:
        # Full leading extent always satisfies the tiling constraint.
        return total_rows
    max_rows = max(8, (budget_bytes // max(row_bytes, 1)) // 8 * 8)
    bm = min(total_rows, max_rows)
    # Shrink in multiples of 8 until it divides total_rows; terminates at 8.
    while total_rows % bm != 0:
        bm -= 8
    return bm


def expand_temporal_dim(x_seq: jax.Array, T: int) -> jax.Array:
    """(T*B, *rest) -> (T, B, *rest), matching torch .view semantics."""
    TB = x_seq.shape[0]
    rest = x_seq.shape[1:]
    assert TB % T == 0, "leading dim must be divisible by T"
    B = TB // T

    # Flatten trailing dims -> lane-dense 2D layout (metadata-only reshape).
    chw = 1
    for d in rest:
        chw *= d

    if TB == 0 or chw == 0:
        # Degenerate empty tensor: no data to move.
        return x_seq.reshape((T, B) + rest)

    x2d = x_seq.reshape(TB, chw)

    itemsize = jnp.dtype(x_seq.dtype).itemsize
    bm = _pick_row_block(TB, chw * itemsize)
    grid = (TB // bm,)

    # Last block dim equals the full array extent -> always legal; it is also
    # lane-dense whenever chw is a multiple of 128 (typical CHW sizes).
    block_spec = pl.BlockSpec((bm, chw), lambda i: (i, 0))

    y2d = pl.pallas_call(
        _copy_kernel,
        out_shape=jax.ShapeDtypeStruct((TB, chw), x_seq.dtype),
        grid=grid,
        in_specs=[block_spec],
        out_specs=block_spec,
        compiler_params=pltpu.CompilerParams(
            dimension_semantics=("parallel",)
        ),
    )(x2d)

    # Metadata-only reshape back to the (T, B, *rest) view.
    return y2d.reshape((T, B) + rest)


if __name__ == "__main__":
    T = 2
    B = 2
    C = 4
    H = 16
    W = 16

    key = jax.random.PRNGKey(0)
    x_seq = jax.random.normal(key, (T * B, C, H, W), dtype=jnp.float32)

    out = expand_temporal_dim(x_seq, T)
    out = jax.block_until_ready(out)

    # Reference: plain reshape (what torch .view does on contiguous data).
    ref = x_seq.reshape(T, B, C, H, W)
    assert out.shape == (T, B, C, H, W), out.shape
    assert out.dtype == x_seq.dtype
    assert bool(jnp.array_equal(out, ref)), "mismatch vs reshape reference"

    print("KERNEL_OK")
</pallas_src>

<mosaic_0001>
module attributes {stable_mosaic.version = 11 : i64} {
  func.func @_copy_kernel(%arg0: i32, %arg1: memref<4x1024xf32, #tpu.memory_space<vmem>>, %arg2: memref<4x1024xf32, #tpu.memory_space<vmem>>) attributes {dimension_semantics = [#tpu.dimension_semantics<parallel>], iteration_bounds = array<i64: 1>, scalar_prefetch = 0 : i64, scratch_operands = 0 : i64, tpu.core_type = #tpu.core_type<tc>, window_params = [{transform_indices = @transform_0, window_bounds = array<i64: 4, 1024>}, {transform_indices = @transform_1, window_bounds = array<i64: 4, 1024>}]} {
    %c0 = arith.constant 0 : index
    %c0_0 = arith.constant 0 : index
    %0 = vector.load %arg1[%c0, %c0_0] : memref<4x1024xf32, #tpu.memory_space<vmem>>, vector<4x1024xf32>
    %c0_1 = arith.constant 0 : index
    %c0_2 = arith.constant 0 : index
    %1 = vector.load %arg2[%c0_1, %c0_2] : memref<4x1024xf32, #tpu.memory_space<vmem>>, vector<4x1024xf32>
    tpu.vector_store %arg2[%c0_1, %c0_2], %0 {strides = array<i32>} : memref<4x1024xf32, #tpu.memory_space<vmem>>, vector<4x1024xf32>,
    return
  }
  func.func @transform_0(%arg0: i32) -> (i32, i32) {
    %c0_i32 = arith.constant 0 : i32
    %c0_i32_0 = arith.constant 0 : i32
    return %arg0, %c0_i32 : i32, i32
  }
  func.func @transform_1(%arg0: i32) -> (i32, i32) {
    %c0_i32 = arith.constant 0 : i32
    %c0_i32_0 = arith.constant 0 : i32
    return %arg0, %c0_i32 : i32, i32
  }
}

</mosaic_0001>

<bundles_post_ra>
// kernel: tpu_custom_call.1
= control target key start
LH: loop header
LB: loop body
LE: loop exit
PB: predicated region body
PF: predicated region fallthrough
CT: control target
= control target key end

     0   :  { %6 = vsyncpa [#allocation3], 0  ;;  %s108_s0 = inlined_call_operand.hbm [shape: f32[4,1024], index: 0, kind: input, shape index: {}]   ;;  %s109_s1 = inlined_call_operand.hbm [shape: f32[4,1024], index: 1, kind: output, shape index: {}]  }
   0x1   :  { %7 = vsyncpa [#allocation4], 0  ;;  %s90_s6 = smov [#allocation2]  }
   0x2   :  { %s14_s7 = sshll.u32 %s90_s6, 4  ;;  %s15_s7 = int_to_ptr.vmem [resolvable:$true] %s14_s7 }
   0x3   :  { %s54_s8 = scalar_lea.vmem %s15_s7, 512  ;;  %p59_p1 = scmp.lt.s32.totalorder %s15_s7, %s15_s7 }
   0x4   :  { %p55_p0 = scmp.ne.s32.totalorder %s15_s7, %s54_s8  ;;  %p60_p2 = scmp.lt.s32.totalorder %s54_s8, %s54_s8 }
   0x6   :  { %p61_p3 = por %p60_p2, %p59_p1 }
   0x8   :  { %p62_p4 = pnand %p61_p3, %p55_p0 }
   0xa   :  { %65 = shalt.err (!%p62_p4)
}
   0xb   :  { %17 = dma.hbm_to_vmem [thread:$0]  %s108_s0, 512, %s15_s7, [#allocation3]  }
   0xc   :  { %86 = dma.done.wait [#allocation3], 512  }
   0xd   :  { %87 = vsyncadd [#allocation3], 4294966784  ;;  %s91_s11 = smov [#allocation5]   ;;  %v21_v0 = vld [vmem:[#allocation2] sm:$0xff]  ;;  %v22_v1 = vld [vmem:[#allocation2 + $0x8] sm:$0xff] }
   0xe   :  { %s35_s12 = sshll.u32 %s91_s11, 4  ;;  %v23_v2 = vld [vmem:[#allocation2 + $0x10] sm:$0xff]  ;;  %25 = vst [vmem:[#allocation5] sm:$0xff] %v21_v0  ;;  %26 = vst [vmem:[#allocation5 + $0x8] sm:$0xff] %v22_v1  ;;  %v24_v3 = vld [vmem:[#allocation2 + $0x18] sm:$0xff]  ;;  %s36_s12 = int_to_ptr.vmem [resolvable:$true] %s35_s12 }
   0xf   :  { %27 = vst [vmem:[#allocation5 + $0x10] sm:$0xff] %v23_v2  ;;  %28 = vst [vmem:[#allocation5 + $0x18] sm:$0xff] %v24_v3  ;;  %s66_s13 = scalar_lea.vmem %s36_s12, 512  ;;  %p71_p6 = scmp.lt.s32.totalorder %s36_s12, %s36_s12 }
  0x10   :  { %p67_p5 = scmp.ne.s32.totalorder %s36_s12, %s66_s13  ;;  %p72_p7 = scmp.lt.s32.totalorder %s66_s13, %s66_s13 }
  0x12   :  { %p73_p8 = por %p72_p7, %p71_p6 }
  0x14   :  { %p74_p9 = pnand %p73_p8, %p67_p5 }
  0x16   :  { %77 = shalt.err (!%p74_p9)
}
  0x17   :  { %38 = dma.vmem_to_hbm [thread:$0]  %s36_s12, 512, %s109_s1, [#allocation4]  }
  0x18   :  { %88 = dma.done.wait [#allocation4], 512  }
  0x19   :  { %89 = vsyncadd [#allocation4], 4294966784 }
  0x1a   :  { %42 = vsyncpa [#allocation3], 1 }
  0x1b   :  { %43 = vsyncpa [#allocation4], 1 }

</bundles_post_ra>
